<compile_context>
chip_gen: v6e
topology: v6e:2x2x1
jax: 0.10.0
libtpu: 0.0.40
codegen_flags: <defaults>
</compile_context>

<pallas_src>
import jax
import jax.numpy as jnp
from jax import lax
from jax.experimental import pallas as pl
from jax.experimental.pallas import tpu as pltpu


# ------------------------------- fused kernel --------------------------------

def t_policy_fused_kernel(cols1_ref, w1_ref, b1_ref, w2_ref, b2_ref,
                          wfc1_ref, bfc1_ref, wfc2_ref, bfc2_ref, o_ref):
    """One batch block of the whole forward.

    cols1 rows (this block): (ph, pw, ow, oh, n)  [n fastest]
    cols1 cols             : (kh2, kw2, cin, kh, kw) = 4 dense im2col patches of T*9 each
    """
    NB = o_ref.shape[0]

    # conv1 (+BN1 folded) + ReLU -- one (64NB,144)@(144,128) matmul.  w1 is block-diagonal
    # over the 4 conv2 taps (kh2,kw2), so output columns are (kh2, kw2, cout) = 128 lanes.
    y1 = jnp.dot(cols1_ref[...], w1_ref[...], preferred_element_type=jnp.float32)
    y1 = jnp.maximum(y1 + b1_ref[...], 0.0)                               # (64NB, 128)

    # MaxPool2d(2,2): the 4 pool members (ph,pw) are 4 contiguous row blocks.
    S = 16 * NB
    pooled = jnp.maximum(jnp.maximum(y1[0:S], y1[S:2 * S]),
                         jnp.maximum(y1[2 * S:3 * S], y1[3 * S:4 * S]))   # (16NB, 128)

    # conv2 (+BN2 folded) + ReLU -- one (4NB,512)@(512,128) matmul.  lhs = lane-aligned
    # concat of the 4 `ow` row blocks (each exactly 128 lanes); w2 is block-diagonal over
    # ow, so output columns are (ow, cout) = 128 lanes, rows are (oh, n).
    P = 4 * NB
    lhs2 = jnp.concatenate([pooled[t * P:(t + 1) * P] for t in range(4)], axis=-1)
    y2 = jnp.dot(lhs2, w2_ref[...], preferred_element_type=jnp.float32)
    y2 = jnp.maximum(y2 + b2_ref[...], 0.0)                               # (4NB, 128)

    # fc1 + ReLU -- one (NB,512)@(512,128) matmul.  torch's .view(-1,512) flatten is one
    # more lane concat of the 4 `oh` row blocks; the fc1 weight was permuted to the
    # matching (oh, ow, c) feature order in prepare_params.
    lhs3 = jnp.concatenate([y2[o * NB:(o + 1) * NB] for o in range(4)], axis=-1)
    h = jnp.dot(lhs3, wfc1_ref[...], preferred_element_type=jnp.float32)
    h = jnp.maximum(h + bfc1_ref[...], 0.0)                               # (NB, 128)

    # fc2 + softmax over a lane-dense 128-wide output: pad columns carry zero weight and a
    # -1e30 bias, so they contribute exp(.) == 0 to the normalizer.
    logits = jnp.dot(h, wfc2_ref[...], preferred_element_type=jnp.float32) + bfc2_ref[...]
    m = jnp.max(logits, axis=-1, keepdims=True)
    e = jnp.exp(logits - m)
    o_ref[...] = e * pl.reciprocal(jnp.sum(e, axis=-1, keepdims=True), approx=False)


# -------------------------------- call helpers --------------------------------

def _im2col_conv1(x, nb):
    """x: (N, T, 33, 33) -> (64N, 4*T*9) dense im2col for conv1 (k=3, stride 2).

    Rows ordered (n_outer, ph, pw, ow, oh, n_inner); columns (kh2, kw2, cin, kh, kw).
    h1 = 4*oh + 2*kh2 + ph, w1 = 4*ow + 2*kw2 + pw.  No zero padding bytes."""
    N, C, H, W = x.shape
    Ho = (H - 3) // 2 + 1
    Wo = (W - 3) // 2 + 1
    assert Ho == 16 and Wo == 16, (Ho, Wo)     # required by the .view(-1, 512) flatten
    assert N % nb == 0
    taps = []
    for kh in range(3):
        for kw in range(3):
            taps.append(x[:, :, kh:kh + 2 * (Ho - 1) + 1:2,
                              kw:kw + 2 * (Wo - 1) + 1:2])       # (N, C, 16, 16)
    cols = jnp.stack(taps, axis=2)                               # (N, C, 9, 16, 16)
    cols = cols.reshape(N // nb, nb, C, 9, 4, 2, 2, 4, 2, 2)     # (no,ni,cin,t9,oh,kh2,ph,ow,kw2,pw)
    cols = jnp.transpose(cols, (0, 6, 9, 7, 4, 1, 5, 8, 2, 3))   # (no,ph,pw,ow,oh,ni,kh2,kw2,cin,t9)
    return cols.reshape(64 * N, 4 * C * 9)


def t_policy_forward(x, pk, T):
    """x: (N, T, 33, 33) float32; pk: packed params from prepare_params.  Returns (N, T)."""
    N = x.shape[0]
    nb = N if N <= 8 else 8                    # samples per grid step (batch block)
    assert N % nb == 0, "pad the batch to a multiple of 8 for large N"
    nblk = N // nb
    cols1 = _im2col_conv1(x, nb)
    K = cols1.shape[1]
    weights = (pk["w1"], pk["b1"], pk["w2"], pk["b2"],
               pk["wfc1"], pk["bfc1"], pk["wfc2"], pk["bfc2"])
    out = pl.pallas_call(
        t_policy_fused_kernel,
        grid=(nblk,),
        out_shape=jax.ShapeDtypeStruct((N, 128), jnp.float32),
        in_specs=[pl.BlockSpec((64 * nb, K), lambda i: (i, 0))] +
                 [pl.BlockSpec(w.shape, lambda i: (0, 0)) for w in weights],
        out_specs=pl.BlockSpec((nb, 128), lambda i: (i, 0)),
        compiler_params=pltpu.CompilerParams(
            dimension_semantics=("parallel",)),     # batch blocks shard across TCs (v7x)
    )(cols1, *weights)
    return out[:, :T]


# --------------------- one-time parameter packing / BN fold -------------------

def prepare_params(p):
    """Fold eval-mode BatchNorm into the convs and pack every weight once into the layouts
    the fused kernel consumes (block-diagonal conv weights, permuted fc1, lane-padded fc2)."""
    T = p["w_conv1"].shape[1]
    K1 = T * 9
    f32 = jnp.float32

    # conv1 + BN1 fold: (K1, 32) with rows (cin, kh, kw); block-diag over taps t=kh2*2+kw2.
    w1 = (p["w_conv1"].reshape(32, K1) * p["bn1_scale"][:, None]).T
    w1bd = jnp.zeros((4 * K1, 128), f32)
    for t in range(4):
        w1bd = w1bd.at[t * K1:(t + 1) * K1, t * 32:(t + 1) * 32].set(w1)
    b1 = p["b_conv1"] * p["bn1_scale"] + p["bn1_shift"]
    b1t = jnp.tile(b1, 4)[None, :]

    # conv2 + BN2 fold: (128, 32) with rows (kh2, kw2, cin); block-diag over the 4 `ow`.
    w2 = p["w_conv2"] * p["bn2_scale"][:, None, None, None]
    w2p = jnp.transpose(w2, (2, 3, 1, 0)).reshape(128, 32)
    w2bd = jnp.zeros((512, 128), f32)
    for o in range(4):
        w2bd = w2bd.at[o * 128:(o + 1) * 128, o * 32:(o + 1) * 32].set(w2p)
    b2 = p["b_conv2"] * p["bn2_scale"] + p["bn2_shift"]
    b2t = jnp.tile(b2, 4)[None, :]

    # fc1: torch feature f = c*16 + oh*4 + ow  ->  kernel lane oh*128 + ow*32 + c.
    wfc1 = jnp.transpose(p["w_fc1"].reshape(128, 32, 4, 4), (2, 3, 1, 0)).reshape(512, 128)
    bfc1 = p["b_fc1"][None, :]

    # fc2 padded to a lane-dense 128-wide output; pad lanes get a large finite negative
    # bias so softmax assigns them exactly zero probability (no inf-inf/NaN edge cases).
    Tn = p["w_fc2"].shape[0]
    wfc2 = jnp.zeros((128, 128), f32).at[:, :Tn].set(p["w_fc2"].T)
    bfc2 = jnp.full((1, 128), -1e30, f32).at[0, :Tn].set(p["b_fc2"])

    return dict(w1=w1bd, b1=b1t, w2=w2bd, b2=b2t,
                wfc1=wfc1, bfc1=bfc1, wfc2=wfc2, bfc2=bfc2)


# ------------------------- deterministic raw parameters ------------------------

def init_params(key, T):
    ks = jax.random.split(key, 16)
    nrm = lambda k, shape, s=0.1: s * jax.random.normal(k, shape, jnp.float32)
    eps = 1e-5

    def bn(kg, kb, km, kv):
        g = 1.0 + 0.1 * jax.random.normal(kg, (32,), jnp.float32)
        b = 0.1 * jax.random.normal(kb, (32,), jnp.float32)
        m = 0.05 * jax.random.normal(km, (32,), jnp.float32)
        v = 1.0 + 0.1 * jnp.abs(jax.random.normal(kv, (32,), jnp.float32))
        scale = g / jnp.sqrt(v + eps)
        shift = b - m * scale
        return scale, shift

    bn1_scale, bn1_shift = bn(ks[8], ks[9], ks[10], ks[11])
    bn2_scale, bn2_shift = bn(ks[12], ks[13], ks[14], ks[15])

    return dict(
        w_conv1=nrm(ks[0], (32, T, 3, 3)),     # torch layout (Cout, Cin, kh, kw)
        b_conv1=nrm(ks[1], (32,)),
        w_conv2=nrm(ks[2], (32, 32, 2, 2)),
        b_conv2=nrm(ks[3], (32,)),
        w_fc1=nrm(ks[4], (128, 512), 0.05),    # torch layout (out, in)
        b_fc1=nrm(ks[5], (128,)),
        w_fc2=nrm(ks[6], (T, 128), 0.05),
        b_fc2=nrm(ks[7], (T,)),
        bn1_scale=bn1_scale, bn1_shift=bn1_shift,
        bn2_scale=bn2_scale, bn2_shift=bn2_shift,
    )


# ------------------------------ pure-JAX reference ---------------------------

def ref_forward(x, p):
    per_c = lambda v: v[None, :, None, None]
    dn = ("NCHW", "OIHW", "NCHW")
    y = lax.conv_general_dilated(x, p["w_conv1"], (2, 2), "VALID",
                                 dimension_numbers=dn) + per_c(p["b_conv1"])
    y = jnp.maximum(y * per_c(p["bn1_scale"]) + per_c(p["bn1_shift"]), 0.0)
    y = lax.reduce_window(y, -jnp.inf, lax.max, (1, 1, 2, 2), (1, 1, 2, 2), "VALID")
    y = lax.conv_general_dilated(y, p["w_conv2"], (2, 2), "VALID",
                                 dimension_numbers=dn) + per_c(p["b_conv2"])
    y = jnp.maximum(y * per_c(p["bn2_scale"]) + per_c(p["bn2_shift"]), 0.0)
    flat = y.reshape(x.shape[0], 512)
    h = jnp.maximum(flat @ p["w_fc1"].T + p["b_fc1"], 0.0)
    logits = h @ p["w_fc2"].T + p["b_fc2"]
    return jax.nn.softmax(logits, axis=1)


# ----------------------------------- main ------------------------------------

if __name__ == "__main__":
    T, N = 4, 2
    # spatial 33x33 so the conv stack yields (N, 32, 4, 4) -> view(-1, 512)
    key = jax.random.PRNGKey(0)
    kx, kp = jax.random.split(key)
    x = jax.random.normal(kx, (N, T, 33, 33), jnp.float32)
    params = init_params(kp, T)
    packed = prepare_params(params)          # one-time BN fold + weight packing

    fwd = jax.jit(t_policy_forward, static_argnames=("T",))
    out = jax.block_until_ready(fwd(x, packed, T=T))

    ref = ref_forward(x, params)
    assert out.shape == (N, T), out.shape
    assert jnp.allclose(jnp.sum(out, axis=1), 1.0, atol=1e-5)
    assert jnp.allclose(out, ref, atol=1e-4, rtol=1e-4), \
        float(jnp.max(jnp.abs(out - ref)))
    print("KERNEL_OK")
</pallas_src>

<mosaic_0001>
module attributes {stable_mosaic.version = 11 : i64} {
  func.func @t_policy_fused_kernel(%arg0: i32, %arg1: memref<128x144xf32, #tpu.memory_space<vmem>>, %arg2: memref<144x128xf32, #tpu.memory_space<vmem>>, %arg3: memref<1x128xf32, #tpu.memory_space<vmem>>, %arg4: memref<512x128xf32, #tpu.memory_space<vmem>>, %arg5: memref<1x128xf32, #tpu.memory_space<vmem>>, %arg6: memref<512x128xf32, #tpu.memory_space<vmem>>, %arg7: memref<1x128xf32, #tpu.memory_space<vmem>>, %arg8: memref<128x128xf32, #tpu.memory_space<vmem>>, %arg9: memref<1x128xf32, #tpu.memory_space<vmem>>, %arg10: memref<2x128xf32, #tpu.memory_space<vmem>>) attributes {dimension_semantics = [#tpu.dimension_semantics<parallel>], iteration_bounds = array<i64: 1>, scalar_prefetch = 0 : i64, scratch_operands = 0 : i64, tpu.core_type = #tpu.core_type<tc>, window_params = [{transform_indices = @transform_0, window_bounds = array<i64: 128, 144>}, {pipeline_mode = #tpu.pipeline_mode<synchronous>, transform_indices = @transform_1, window_bounds = array<i64: 144, 128>}, {pipeline_mode = #tpu.pipeline_mode<synchronous>, transform_indices = @transform_2, window_bounds = array<i64: 1, 128>}, {pipeline_mode = #tpu.pipeline_mode<synchronous>, transform_indices = @transform_3, window_bounds = array<i64: 512, 128>}, {pipeline_mode = #tpu.pipeline_mode<synchronous>, transform_indices = @transform_4, window_bounds = array<i64: 1, 128>}, {pipeline_mode = #tpu.pipeline_mode<synchronous>, transform_indices = @transform_5, window_bounds = array<i64: 512, 128>}, {pipeline_mode = #tpu.pipeline_mode<synchronous>, transform_indices = @transform_6, window_bounds = array<i64: 1, 128>}, {pipeline_mode = #tpu.pipeline_mode<synchronous>, transform_indices = @transform_7, window_bounds = array<i64: 128, 128>}, {pipeline_mode = #tpu.pipeline_mode<synchronous>, transform_indices = @transform_8, window_bounds = array<i64: 1, 128>}, {transform_indices = @transform_9, window_bounds = array<i64: 2, 128>}]} {
    %c0 = arith.constant 0 : index
    %c0_0 = arith.constant 0 : index
    %0 = vector.load %arg1[%c0, %c0_0] : memref<128x144xf32, #tpu.memory_space<vmem>>, vector<128x144xf32>
    %c0_1 = arith.constant 0 : index
    %c0_2 = arith.constant 0 : index
    %1 = vector.load %arg2[%c0_1, %c0_2] : memref<144x128xf32, #tpu.memory_space<vmem>>, vector<144x128xf32>
    %cst = arith.constant dense<0.000000e+00> : vector<128x128xf32>
    %2 = tpu.matmul %0, %1, %cst {dimension_numbers = #tpu.dot_dimension_numbers<[1], [0], [0], [1], [0, 0, 1, 1], [], []>} : vector<128x144xf32>, vector<144x128xf32>, vector<128x128xf32> -> vector<128x128xf32>
    %c0_3 = arith.constant 0 : index
    %c0_4 = arith.constant 0 : index
    %3 = vector.load %arg3[%c0_3, %c0_4] : memref<1x128xf32, #tpu.memory_space<vmem>>, vector<1x128xf32>
    %4 = vector.broadcast %3 : vector<1x128xf32> to vector<128x128xf32>
    %5 = arith.addf %2, %4 : vector<128x128xf32>
    %cst_5 = arith.constant 0.000000e+00 : f32
    %6 = vector.broadcast %cst_5 : f32 to vector<128x128xf32>
    %7 = arith.maximumf %5, %6 : vector<128x128xf32>
    %8 = vector.extract_strided_slice %7 {offsets = [0, 0], sizes = [32, 128], strides = [1, 1]} : vector<128x128xf32> to vector<32x128xf32>
    %9 = vector.extract_strided_slice %7 {offsets = [32, 0], sizes = [32, 128], strides = [1, 1]} : vector<128x128xf32> to vector<32x128xf32>
    %10 = arith.maximumf %8, %9 : vector<32x128xf32>
    %11 = vector.extract_strided_slice %7 {offsets = [64, 0], sizes = [32, 128], strides = [1, 1]} : vector<128x128xf32> to vector<32x128xf32>
    %12 = vector.extract_strided_slice %7 {offsets = [96, 0], sizes = [32, 128], strides = [1, 1]} : vector<128x128xf32> to vector<32x128xf32>
    %13 = arith.maximumf %11, %12 : vector<32x128xf32>
    %14 = arith.maximumf %10, %13 : vector<32x128xf32>
    %15 = vector.extract_strided_slice %14 {offsets = [0, 0], sizes = [8, 128], strides = [1, 1]} : vector<32x128xf32> to vector<8x128xf32>
    %16 = vector.extract_strided_slice %14 {offsets = [8, 0], sizes = [8, 128], strides = [1, 1]} : vector<32x128xf32> to vector<8x128xf32>
    %17 = vector.extract_strided_slice %14 {offsets = [16, 0], sizes = [8, 128], strides = [1, 1]} : vector<32x128xf32> to vector<8x128xf32>
    %18 = vector.extract_strided_slice %14 {offsets = [24, 0], sizes = [8, 128], strides = [1, 1]} : vector<32x128xf32> to vector<8x128xf32>
    %19 = tpu.concatenate %15, %16, %17, %18 in 1 : vector<8x128xf32>, vector<8x128xf32>, vector<8x128xf32>, vector<8x128xf32> -> vector<8x512xf32>
    %c0_6 = arith.constant 0 : index
    %c0_7 = arith.constant 0 : index
    %20 = vector.load %arg4[%c0_6, %c0_7] : memref<512x128xf32, #tpu.memory_space<vmem>>, vector<512x128xf32>
    %cst_8 = arith.constant dense<0.000000e+00> : vector<8x128xf32>
    %21 = tpu.matmul %19, %20, %cst_8 {dimension_numbers = #tpu.dot_dimension_numbers<[1], [0], [0], [1], [0, 0, 1, 1], [], []>} : vector<8x512xf32>, vector<512x128xf32>, vector<8x128xf32> -> vector<8x128xf32>
    %c0_9 = arith.constant 0 : index
    %c0_10 = arith.constant 0 : index
    %22 = vector.load %arg5[%c0_9, %c0_10] : memref<1x128xf32, #tpu.memory_space<vmem>>, vector<1x128xf32>
    %23 = vector.broadcast %22 : vector<1x128xf32> to vector<8x128xf32>
    %24 = arith.addf %21, %23 : vector<8x128xf32>
    %cst_11 = arith.constant 0.000000e+00 : f32
    %25 = vector.broadcast %cst_11 : f32 to vector<8x128xf32>
    %26 = arith.maximumf %24, %25 : vector<8x128xf32>
    %27 = vector.extract_strided_slice %26 {offsets = [0, 0], sizes = [2, 128], strides = [1, 1]} : vector<8x128xf32> to vector<2x128xf32>
    %28 = vector.extract_strided_slice %26 {offsets = [2, 0], sizes = [2, 128], strides = [1, 1]} : vector<8x128xf32> to vector<2x128xf32>
    %29 = vector.extract_strided_slice %26 {offsets = [4, 0], sizes = [2, 128], strides = [1, 1]} : vector<8x128xf32> to vector<2x128xf32>
    %30 = vector.extract_strided_slice %26 {offsets = [6, 0], sizes = [2, 128], strides = [1, 1]} : vector<8x128xf32> to vector<2x128xf32>
    %31 = tpu.concatenate %27, %28, %29, %30 in 1 : vector<2x128xf32>, vector<2x128xf32>, vector<2x128xf32>, vector<2x128xf32> -> vector<2x512xf32>
    %c0_12 = arith.constant 0 : index
    %c0_13 = arith.constant 0 : index
    %32 = vector.load %arg6[%c0_12, %c0_13] : memref<512x128xf32, #tpu.memory_space<vmem>>, vector<512x128xf32>
    %cst_14 = arith.constant dense<0.000000e+00> : vector<2x128xf32>
    %33 = tpu.matmul %31, %32, %cst_14 {dimension_numbers = #tpu.dot_dimension_numbers<[1], [0], [0], [1], [0, 0, 1, 1], [], []>} : vector<2x512xf32>, vector<512x128xf32>, vector<2x128xf32> -> vector<2x128xf32>
    %c0_15 = arith.constant 0 : index
    %c0_16 = arith.constant 0 : index
    %34 = vector.load %arg7[%c0_15, %c0_16] : memref<1x128xf32, #tpu.memory_space<vmem>>, vector<1x128xf32>
    %35 = vector.broadcast %34 : vector<1x128xf32> to vector<2x128xf32>
    %36 = arith.addf %33, %35 : vector<2x128xf32>
    %cst_17 = arith.constant 0.000000e+00 : f32
    %37 = vector.broadcast %cst_17 : f32 to vector<2x128xf32>
    %38 = arith.maximumf %36, %37 : vector<2x128xf32>
    %c0_18 = arith.constant 0 : index
    %c0_19 = arith.constant 0 : index
    %39 = vector.load %arg8[%c0_18, %c0_19] : memref<128x128xf32, #tpu.memory_space<vmem>>, vector<128x128xf32>
    %cst_20 = arith.constant dense<0.000000e+00> : vector<2x128xf32>
    %40 = tpu.matmul %38, %39, %cst_20 {dimension_numbers = #tpu.dot_dimension_numbers<[1], [0], [0], [1], [0, 0, 1, 1], [], []>} : vector<2x128xf32>, vector<128x128xf32>, vector<2x128xf32> -> vector<2x128xf32>
    %c0_21 = arith.constant 0 : index
    %c0_22 = arith.constant 0 : index
    %41 = vector.load %arg9[%c0_21, %c0_22] : memref<1x128xf32, #tpu.memory_space<vmem>>, vector<1x128xf32>
    %42 = vector.broadcast %41 : vector<1x128xf32> to vector<2x128xf32>
    %43 = arith.addf %40, %42 : vector<2x128xf32>
    %cst_23 = arith.constant dense<0xFF800000> : vector<2xf32>
    %44 = vector.multi_reduction <maximumf>, %43, %cst_23 [1] : vector<2x128xf32> to vector<2xf32>
    %45 = vector.shape_cast %44 : vector<2xf32> to vector<2x1xf32>
    %46 = vector.broadcast %45 : vector<2x1xf32> to vector<2x128xf32>
    %47 = arith.subf %43, %46 : vector<2x128xf32>
    %48 = math.exp %47 : vector<2x128xf32>
    %cst_24 = arith.constant dense<0.000000e+00> : vector<2xf32>
    %49 = vector.multi_reduction <add>, %48, %cst_24 [1] : vector<2x128xf32> to vector<2xf32>
    %50 = vector.shape_cast %49 : vector<2xf32> to vector<2x1xf32>
    %51 = tpu.reciprocal %50 : vector<2x1xf32> -> vector<2x1xf32>
    %52 = vector.broadcast %51 : vector<2x1xf32> to vector<2x128xf32>
    %53 = arith.mulf %48, %52 : vector<2x128xf32>
    %c0_25 = arith.constant 0 : index
    %c0_26 = arith.constant 0 : index
    %54 = vector.load %arg10[%c0_25, %c0_26] : memref<2x128xf32, #tpu.memory_space<vmem>>, vector<2x128xf32>
    tpu.vector_store %arg10[%c0_25, %c0_26], %53 {strides = array<i32>} : memref<2x128xf32, #tpu.memory_space<vmem>>, vector<2x128xf32>,
    return
  }
  func.func @transform_0(%arg0: i32) -> (i32, i32) {
    %c0_i32 = arith.constant 0 : i32
    %c0_i32_0 = arith.constant 0 : i32
    return %arg0, %c0_i32 : i32, i32
  }
  func.func @transform_1(%arg0: i32) -> (i32, i32) {
    %c0_i32 = arith.constant 0 : i32
    %c0_i32_0 = arith.constant 0 : i32
    %c0_i32_1 = arith.constant 0 : i32
    return %c0_i32, %c0_i32_0 : i32, i32
  }
  func.func @transform_2(%arg0: i32) -> (i32, i32) {
    %c0_i32 = arith.constant 0 : i32
    %c0_i32_0 = arith.constant 0 : i32
    %c0_i32_1 = arith.constant 0 : i32
    return %c0_i32, %c0_i32_0 : i32, i32
  }
  func.func @transform_3(%arg0: i32) -> (i32, i32) {
    %c0_i32 = arith.constant 0 : i32
    %c0_i32_0 = arith.constant 0 : i32
    %c0_i32_1 = arith.constant 0 : i32
    return %c0_i32, %c0_i32_0 : i32, i32
  }
  func.func @transform_4(%arg0: i32) -> (i32, i32) {
    %c0_i32 = arith.constant 0 : i32
    %c0_i32_0 = arith.constant 0 : i32
    %c0_i32_1 = arith.constant 0 : i32
    return %c0_i32, %c0_i32_0 : i32, i32
  }
  func.func @transform_5(%arg0: i32) -> (i32, i32) {
    %c0_i32 = arith.constant 0 : i32
    %c0_i32_0 = arith.constant 0 : i32
    %c0_i32_1 = arith.constant 0 : i32
    return %c0_i32, %c0_i32_0 : i32, i32
  }
  func.func @transform_6(%arg0: i32) -> (i32, i32) {
    %c0_i32 = arith.constant 0 : i32
    %c0_i32_0 = arith.constant 0 : i32
    %c0_i32_1 = arith.constant 0 : i32
    return %c0_i32, %c0_i32_0 : i32, i32
  }
  func.func @transform_7(%arg0: i32) -> (i32, i32) {
    %c0_i32 = arith.constant 0 : i32
    %c0_i32_0 = arith.constant 0 : i32
    %c0_i32_1 = arith.constant 0 : i32
    return %c0_i32, %c0_i32_0 : i32, i32
  }
  func.func @transform_8(%arg0: i32) -> (i32, i32) {
    %c0_i32 = arith.constant 0 : i32
    %c0_i32_0 = arith.constant 0 : i32
    %c0_i32_1 = arith.constant 0 : i32
    return %c0_i32, %c0_i32_0 : i32, i32
  }
  func.func @transform_9(%arg0: i32) -> (i32, i32) {
    %c0_i32 = arith.constant 0 : i32
    %c0_i32_0 = arith.constant 0 : i32
    return %arg0, %c0_i32 : i32, i32
  }
}

</mosaic_0001>

<bundles_post_ra>
// kernel: t_policy_forward.1
= control target key start
LH: loop header
LB: loop body
LE: loop exit
PB: predicated region body
PF: predicated region fallthrough
CT: control target
= control target key end

     0   :  { %v1104_v1 = vmov 0.0   ;;  %vm90_vm0 = vcmask 130048   ;;  %s1832_s0 = inlined_call_operand.vmem [shape: f32[128,144], index: 0, kind: input, shape index: {}]   ;;  %s1833_s1 = inlined_call_operand.vmem [shape: f32[144,128], index: 1, kind: input, shape index: {}]   ;;  %s1834_s2 = inlined_call_operand.vmem [shape: f32[1,128], index: 2, kind: input, shape index: {}]   ;;  %s1835_s3 = inlined_call_operand.vmem [shape: f32[512,128], index: 3, kind: input, shape index: {}]   ;;  %s1836_s4 = inlined_call_operand.vmem [shape: f32[1,128], index: 4, kind: input, shape index: {}]   ;;  %s1837_s5 = inlined_call_operand.vmem [shape: f32[512,128], index: 5, kind: input, shape index: {}]   ;;  %s1838_s6 = inlined_call_operand.vmem [shape: f32[1,128], index: 6, kind: input, shape index: {}]   ;;  %s1839_s7 = inlined_call_operand.vmem [shape: f32[128,128], index: 7, kind: input, shape index: {}]   ;;  %s1840_s8 = inlined_call_operand.vmem [shape: f32[1,128], index: 8, kind: input, shape index: {}]   ;;  %s1841_s9 = inlined_call_operand.hbm [shape: f32[2,128], index: 9, kind: output, shape index: {}]  }
   0x1   :  { %v80_v0 = vld [vmem:[%s1833_s1 + $0x78] sm:$0xff]  ;;  %139 = vmatprep.subr.mxu0 %v1104_v1  ;;  %v79_v2 = vld [vmem:[%s1833_s1 + $0x70] sm:$0xff]  ;;  %v78_v3 = vld [vmem:[%s1833_s1 + $0x68] sm:$0xff] }
   0x2   :  { %140 = vmatpush1.msra.mxu0 %v80_v0  ;;  %v77_v4 = vld [vmem:[%s1833_s1 + $0x60] sm:$0xff]  ;;  %v34_v5 = vld [vmem:[%s1832_s0 + $0x8] sm:$0xff]  ;;  %v76_v6 = vld [vmem:[%s1833_s1 + $0x58] sm:$0xff] }
   0x3   :  { %141 = vmatprep.subr.mxu0 %v1104_v1  ;;  %864 = vmatprep.mubr.msk.f32.mxu0 %vm90_vm0, %v34_v5  ;;  %v75_v7 = vld [vmem:[%s1833_s1 + $0x50] sm:$0xff]  ;;  %v74_v8 = vld [vmem:[%s1833_s1 + $0x48] sm:$0xff]  ;;  %v73_v9 = vld [vmem:[%s1833_s1 + $0x40] sm:$0xff] }
   0x4   :  { %142 = vmatpush1.msra.mxu0 %v79_v2  ;;  %v72_v10 = vld [vmem:[%s1833_s1 + $0x38] sm:$0xff]  ;;  %v71_v11 = vld [vmem:[%s1833_s1 + $0x30] sm:$0xff] }
   0x5   :  { %143 = vmatprep.subr.mxu0 %v1104_v1 }
   0x6   :  { %144 = vmatpush1.msra.mxu0 %v78_v3 }
   0x7   :  { %145 = vmatprep.subr.mxu0 %v1104_v1 }
   0x8   :  { %146 = vmatpush1.msra.mxu0 %v77_v4 }
   0x9   :  { %147 = vmatprep.subr.mxu0 %v1104_v1 }
   0xa   :  { %148 = vmatpush1.msra.mxu0 %v76_v6 }
   0xb   :  { %149 = vmatprep.subr.mxu0 %v1104_v1 }
   0xc   :  { %150 = vmatpush1.msra.mxu0 %v75_v7 }
   0xd   :  { %151 = vmatprep.subr.mxu0 %v1104_v1 }
   0xe   :  { %152 = vmatpush1.msra.mxu0 %v74_v8 }
   0xf   :  { %153 = vmatprep.subr.mxu0 %v1104_v1 }
  0x10   :  { %154 = vmatpush1.msra.mxu0 %v73_v9 }
  0x11   :  { %155 = vmatprep.subr.mxu0 %v1104_v1 }
  0x12   :  { %14 = vsyncpa [#allocation3], 0  ;;  %156 = vmatpush1.msra.mxu0 %v72_v10  ;;  %v70_v12 = vld [vmem:[%s1833_s1 + $0x28] sm:$0xff]  ;;  %v69_v13 = vld [vmem:[%s1833_s1 + $0x20] sm:$0xff]  ;;  %vm1105_vm1 = vmmov 0   ;;  %vm836_vm2 = vcmask 1041408  }
  0x13   :  { %157 = vmatprep.subr.mxu0 %v1104_v1  ;;  %v68_v14 = vld [vmem:[%s1833_s1 + $0x18] sm:$0xff]  ;;  %v67_v15 = vld [vmem:[%s1833_s1 + $0x10] sm:$0xff]  ;;  %v66_v16 = vld [vmem:[%s1833_s1 + $0x8] sm:$0xff] }
  0x14   :  { %158 = vmatpush1.msra.mxu0 %v71_v11  ;;  %v65_v17 = vld [vmem:[%s1833_s1] sm:$0xff]  ;;  %v82_v18 = vld [vmem:[%s1833_s1 + $0x88] sm:$0xff]  ;;  %v36_v21 = vld [vmem:[%s1832_s0 + $0x18] sm:$0xff] }
  0x15   :  { %159 = vmatprep.subr.mxu0 %v1104_v1  ;;  %v81_v19 = vld [vmem:[%s1833_s1 + $0x80] sm:$0xff]  ;;  %v35_v22 = vld [vmem:[%s1832_s0 + $0x10] sm:$0xff]  ;;  %v38_v23 = vld [vmem:[%s1832_s0 + $0x28] sm:$0xff] }
  0x16   :  { %160 = vmatpush1.msra.mxu0 %v70_v12  ;;  %v33_v20 = vld [vmem:[%s1832_s0] sm:$0xff]  ;;  %v40_v25 = vld [vmem:[%s1832_s0 + $0x38] sm:$0xff]  ;;  %v39_v26 = vld [vmem:[%s1832_s0 + $0x30] sm:$0xff] }
  0x17   :  { %161 = vmatprep.subr.mxu0 %v1104_v1  ;;  %v37_v24 = vld [vmem:[%s1832_s0 + $0x20] sm:$0xff]  ;;  %v42_v27 = vld [vmem:[%s1832_s0 + $0x48] sm:$0xff]  ;;  %v44_v29 = vld [vmem:[%s1832_s0 + $0x58] sm:$0xff] }
  0x18   :  { %162 = vmatpush1.msra.mxu0 %v69_v13  ;;  %v41_v28 = vld [vmem:[%s1832_s0 + $0x40] sm:$0xff]  ;;  %v43_v30 = vld [vmem:[%s1832_s0 + $0x50] sm:$0xff]  ;;  %v46_v31 = vld [vmem:[%s1832_s0 + $0x68] sm:$0xff] }
  0x19   :  { %163 = vmatprep.subr.mxu0 %v1104_v1  ;;  %v45_v32 = vld [vmem:[%s1832_s0 + $0x60] sm:$0xff]  ;;  %v48_v33 = vld [vmem:[%s1832_s0 + $0x78] sm:$0xff]  ;;  %v47_v34 = vld [vmem:[%s1832_s0 + $0x70] sm:$0xff] }
  0x1a   :  { %164 = vmatpush1.msra.mxu0 %v68_v14  ;;  %v50_v35 = vld [vmem:[%s1832_s0 + $0x88] sm:$0xff]  ;;  %v49_v36 = vld [vmem:[%s1832_s0 + $0x80] sm:$0xff]  ;;  %v52_v37 = vld [vmem:[%s1832_s0 + $0x98] sm:$0xff] }
  0x1b   :  { %165 = vmatprep.subr.mxu0 %v1104_v1  ;;  %v51_v38 = vld [vmem:[%s1832_s0 + $0x90] sm:$0xff]  ;;  %v54_v39 = vld [vmem:[%s1832_s0 + $0xa8] sm:$0xff]  ;;  %v53_v40 = vld [vmem:[%s1832_s0 + $0xa0] sm:$0xff] }
  0x1c   :  { %166 = vmatpush1.msra.mxu0 %v67_v15  ;;  %v56_v41 = vld [vmem:[%s1832_s0 + $0xb8] sm:$0xff]  ;;  %v55_v42 = vld [vmem:[%s1832_s0 + $0xb0] sm:$0xff]  ;;  %v58_v43 = vld [vmem:[%s1832_s0 + $0xc8] sm:$0xff] }
  0x1d   :  { %167 = vmatprep.subr.mxu0 %v1104_v1  ;;  %v57_v44 = vld [vmem:[%s1832_s0 + $0xc0] sm:$0xff]  ;;  %v60_v45 = vld [vmem:[%s1832_s0 + $0xd8] sm:$0xff]  ;;  %v59_v46 = vld [vmem:[%s1832_s0 + $0xd0] sm:$0xff] }
  0x1e   :  { %168 = vmatpush1.msra.mxu0 %v66_v16  ;;  %v62_v47 = vld [vmem:[%s1832_s0 + $0xe8] sm:$0xff]  ;;  %v61_v48 = vld [vmem:[%s1832_s0 + $0xe0] sm:$0xff]  ;;  %v64_v49 = vld [vmem:[%s1832_s0 + $0xf8] sm:$0xff] }
  0x1f   :  { %169 = vmatprep.subr.mxu0 %v1104_v1  ;;  %v63_v50 = vld [vmem:[%s1832_s0 + $0xf0] sm:$0xff]  ;;  %v343_v51 = vld [vmem:[%s1835_s3 + $0xf8] sm:$0xff]  ;;  %v341_v55 = vld [vmem:[%s1835_s3 + $0xe8] sm:$0xff] }
  0x20   :  { %170 = vmatpush1.msra.mxu0 %v65_v17  ;;  %883 = vmatprep.subr.mxu1 %v343_v51  ;;  %v327_v52 = vld [vmem:[%s1835_s3 + $0x78] sm:$0xff]  ;;  %v342_v53 = vld [vmem:[%s1835_s3 + $0xf0] sm:$0xff]  ;;  %v325_v56 = vld [vmem:[%s1835_s3 + $0x68] sm:$0xff] }
  0x21   :  { %199 = vmatprep.subr.mxu0 %v1104_v1  ;;  %884 = vmatpush3.msra.mxu1 %v327_v52  ;;  %v326_v54 = vld [vmem:[%s1835_s3 + $0x70] sm:$0xff]  ;;  %v340_v57 = vld [vmem:[%s1835_s3 + $0xe0] sm:$0xff]  ;;  %v339_v59 = vld [vmem:[%s1835_s3 + $0xd8] sm:$0xff] }
  0x22   :  { %200 = vmatpush2.msra.mxu0 %v82_v18  ;;  %885 = vmatprep.subr.mxu1 %v342_v53  ;;  %v324_v58 = vld [vmem:[%s1835_s3 + $0x60] sm:$0xff]  ;;  %v323_v60 = vld [vmem:[%s1835_s3 + $0x58] sm:$0xff]  ;;  %v338_v61 = vld [vmem:[%s1835_s3 + $0xd0] sm:$0xff] }
  0x23   :  { %201 = vmatprep.subr.mxu0 %v1104_v1  ;;  %886 = vmatpush3.msra.mxu1 %v326_v54  ;;  %v322_v62 = vld [vmem:[%s1835_s3 + $0x50] sm:$0xff]  ;;  %v337_v63 = vld [vmem:[%s1835_s3 + $0xc8] sm:$0xff]  ;;  %v336_v2 = vld [vmem:[%s1835_s3 + $0xc0] sm:$0xff] }
  0x24   :  { %202 = vmatpush2.msra.mxu0 %v81_v19  ;;  %887 = vmatprep.subr.mxu1 %v341_v55  ;;  %v321_v0 = vld [vmem:[%s1835_s3 + $0x48] sm:$0xff]  ;;  %v320_v3 = vld [vmem:[%s1835_s3 + $0x40] sm:$0xff]  ;;  %v335_v4 = vld [vmem:[%s1835_s3 + $0xb8] sm:$0xff] }
  0x25   :  { %204 = vmatmul.mubr.f32.vlgmr.msra.gmra.mxu0 %v33_v20  ;;  %888 = vmatpush3.msra.mxu1 %v325_v56  ;;  %v319_v5 = vld [vmem:[%s1835_s3 + $0x38] sm:$0xff]  ;;  %v334_v6 = vld [vmem:[%s1835_s3 + $0xb0] sm:$0xff]  ;;  %v333_v8 = vld [vmem:[%s1835_s3 + $0xa8] sm:$0xff] }
  0x26   :  { %865 = vmatprep.mubr.msk.f32.mxu0 %vm90_vm0, %v36_v21  ;;  %889 = vmatprep.subr.mxu1 %v340_v57  ;;  %v318_v7 = vld [vmem:[%s1835_s3 + $0x30] sm:$0xff]  ;;  %v317_v9 = vld [vmem:[%s1835_s3 + $0x28] sm:$0xff]  ;;  %v332_v10 = vld [vmem:[%s1835_s3 + $0xa0] sm:$0xff] }
  0x27   :  { %890 = vmatpush3.msra.mxu1 %v324_v58  ;;  %v316_v11 = vld [vmem:[%s1835_s3 + $0x20] sm:$0xff]  ;;  %v331_v12 = vld [vmem:[%s1835_s3 + $0x98] sm:$0xff]  ;;  %v330_v14 = vld [vmem:[%s1835_s3 + $0x90] sm:$0xff] }
  0x28   :  { %891 = vmatprep.subr.mxu1 %v339_v59  ;;  %v315_v13 = vld [vmem:[%s1835_s3 + $0x18] sm:$0xff]  ;;  %v314_v15 = vld [vmem:[%s1835_s3 + $0x10] sm:$0xff]  ;;  %v329_v16 = vld [vmem:[%s1835_s3 + $0x88] sm:$0xff] }
  0x29   :  { %209 = vmatmul.mubr.f32.gmra.mxu0 %v35_v22  ;;  %892 = vmatpush3.msra.mxu1 %v323_v60  ;;  %v313_v17 = vld [vmem:[%s1835_s3 + $0x8] sm:$0xff]  ;;  %v328_v18 = vld [vmem:[%s1835_s3 + $0x80] sm:$0xff]  ;;  %v375_v20 = vld [vmem:[%s1835_s3 + $0x1f8] sm:$0xff] }
  0x2a   :  { %866 = vmatprep.mubr.msk.f32.mxu0 %vm90_vm0, %v38_v23  ;;  %893 = vmatprep.subr.mxu1 %v338_v61  ;;  %v312_v19 = vld [vmem:[%s1835_s3] sm:$0xff]  ;;  %v594_v21 = vld [vmem:[%s1837_s5 + $0x1f8] sm:$0xff]  ;;  %v593_v23 = vld [vmem:[%s1837_s5 + $0x1f0] sm:$0xff] }
  0x2b   :  { %894 = vmatpush3.msra.mxu1 %v322_v62  ;;  %v578_v22 = vld [vmem:[%s1837_s5 + $0x178] sm:$0xff]  ;;  %988 = vmatprep.subr.mxu0 %v594_v21  ;;  %v1479_v55 = vld [vmem:[%s1834_s2] ss:$0 sm:$0xff] }
  0x2c   :  { %895 = vmatprep.subr.mxu1 %v337_v63  ;;  %989 = vmatpush3.msra.mxu0 %v578_v22 }
  0x2d   :  { %214 = vmatmul.mubr.f32.gmra.mxu0 %v37_v24  ;;  %896 = vmatpush3.msra.mxu1 %v321_v0  ;;  %v577_v24 = vld [vmem:[%s1837_s5 + $0x170] sm:$0xff] }
  0x2e   :  { %867 = vmatprep.mubr.msk.f32.mxu0 %vm90_vm0, %v40_v25  ;;  %897 = vmatprep.subr.mxu1 %v336_v2  ;;  %v592_v25 = vld [vmem:[%s1837_s5 + $0x1e8] sm:$0xff] }
  0x2f   :  { %898 = vmatpush3.msra.mxu1 %v320_v3  ;;  %990 = vmatprep.subr.mxu0 %v593_v23 }
  0x30   :  { %899 = vmatprep.subr.mxu1 %v335_v4  ;;  %991 = vmatpush3.msra.mxu0 %v577_v24 }
  0x31   :  { %219 = vmatmul.mubr.f32.gmra.mxu0 %v39_v26  ;;  %900 = vmatpush3.msra.mxu1 %v319_v5  ;;  %v576_v26 = vld [vmem:[%s1837_s5 + $0x168] sm:$0xff] }
  0x32   :  { %868 = vmatprep.mubr.msk.f32.mxu0 %vm90_vm0, %v42_v27  ;;  %901 = vmatprep.subr.mxu1 %v334_v6  ;;  %v591_v27 = vld [vmem:[%s1837_s5 + $0x1e0] sm:$0xff] }
  0x33   :  { %902 = vmatpush3.msra.mxu1 %v318_v7  ;;  %992 = vmatprep.subr.mxu0 %v592_v25  ;;  %v359_v25 = vld [vmem:[%s1835_s3 + $0x178] sm:$0xff] }
  0x34   :  { %903 = vmatprep.subr.mxu1 %v333_v8  ;;  %993 = vmatpush3.msra.mxu0 %v576_v26 }
  0x35   :  { %224 = vmatmul.mubr.f32.gmra.mxu0 %v41_v28  ;;  %904 = vmatpush3.msra.mxu1 %v317_v9  ;;  %v575_v28 = vld [vmem:[%s1837_s5 + $0x160] sm:$0xff] }
  0x36   :  { %869 = vmatprep.mubr.msk.f32.mxu0 %vm90_vm0, %v44_v29  ;;  %905 = vmatprep.subr.mxu1 %v332_v10  ;;  %v590_v29 = vld [vmem:[%s1837_s5 + $0x1d8] sm:$0xff] }
  0x37   :  { %906 = vmatpush3.msra.mxu1 %v316_v11  ;;  %994 = vmatprep.subr.mxu0 %v591_v27 }
  0x38   :  { %907 = vmatprep.subr.mxu1 %v331_v12  ;;  %995 = vmatpush3.msra.mxu0 %v575_v28  ;;  %v374_v28 = vld [vmem:[%s1835_s3 + $0x1f0] sm:$0xff] }
  0x39   :  { %229 = vmatmul.mubr.f32.gmra.mxu0 %v43_v30  ;;  %908 = vmatpush3.msra.mxu1 %v315_v13  ;;  %v574_v30 = vld [vmem:[%s1837_s5 + $0x158] sm:$0xff] }
  0x3a   :  { %870 = vmatprep.mubr.msk.f32.mxu0 %vm90_vm0, %v46_v31  ;;  %909 = vmatprep.subr.mxu1 %v330_v14 }
  0x3b   :  { %910 = vmatpush3.msra.mxu1 %v314_v15  ;;  %996 = vmatprep.subr.mxu0 %v590_v29  ;;  %v358_v29 = vld [vmem:[%s1835_s3 + $0x170] sm:$0xff] }
  0x3c   :  { %911 = vmatprep.subr.mxu1 %v329_v16  ;;  %997 = vmatpush3.msra.mxu0 %v574_v30 }
  0x3d   :  { %234 = vmatmul.mubr.f32.gmra.mxu0 %v45_v32  ;;  %912 = vmatpush3.msra.mxu1 %v313_v17 }
  0x3e   :  { %871 = vmatprep.mubr.msk.f32.mxu0 %vm90_vm0, %v48_v33  ;;  %913 = vmatprep.subr.mxu1 %v328_v18 }
  0x3f   :  { %914 = vmatpush3.msra.mxu1 %v312_v19 }
  0x40   :  { %918 = vmatprep.subr.mxu1 %v375_v20 }
  0x41   :  { %239 = vmatmul.mubr.f32.gmra.mxu0 %v47_v34 }
  0x42   :  { %872 = vmatprep.mubr.msk.f32.mxu0 %vm90_vm0, %v50_v35 }
  0x45   :  { %244 = vmatmul.mubr.f32.gmra.mxu0 %v49_v36 }
  0x46   :  { %873 = vmatprep.mubr.msk.f32.mxu0 %vm90_vm0, %v52_v37 }
  0x49   :  { %249 = vmatmul.mubr.f32.gmra.mxu0 %v51_v38 }
  0x4a   :  { %874 = vmatprep.mubr.msk.f32.mxu0 %vm90_vm0, %v54_v39 }
  0x4d   :  { %254 = vmatmul.mubr.f32.gmra.mxu0 %v53_v40 }
  0x4e   :  { %875 = vmatprep.mubr.msk.f32.mxu0 %vm90_vm0, %v56_v41 }
  0x51   :  { %259 = vmatmul.mubr.f32.gmra.mxu0 %v55_v42 }
  0x52   :  { %876 = vmatprep.mubr.msk.f32.mxu0 %vm90_vm0, %v58_v43 }
  0x55   :  { %264 = vmatmul.mubr.f32.gmra.mxu0 %v57_v44 }
  0x56   :  { %877 = vmatprep.mubr.msk.f32.mxu0 %vm90_vm0, %v60_v45 }
  0x59   :  { %269 = vmatmul.mubr.f32.gmra.mxu0 %v59_v46 }
  0x5a   :  { %878 = vmatprep.mubr.msk.f32.mxu0 %vm90_vm0, %v62_v47 }
  0x5d   :  { %274 = vmatmul.mubr.f32.gmra.mxu0 %v61_v48 }
  0x5e   :  { %879 = vmatprep.mubr.msk.f32.mxu0 %vm90_vm0, %v64_v49 }
  0x61   :  { %279 = vmatmul.mubr.f32.gmra.mxu0 %v63_v50 }
  0xe5   :  { %v205_v31 = vpop.f32.mrf.mxu0 }
  0xe6   :  { %v206_v0 = vadd.f32 %v1479_v55, %v205_v31 }
  0xe7   :  { %v207_v32 = vpop.f32.mrf.mxu0 }
  0xe8   :  { %v284_v12 = vmax.f32 %v206_v0, 0.0  ;;  %v363_v0 = vld [vmem:[%s1835_s3 + $0x198] sm:$0xff] }
  0xe9   :  { %v210_v33 = vpop.f32.mrf.mxu0 }
  0xea   :  { %v211_v62 = vadd.f32 %v1479_v55, %v210_v33 }
  0xeb   :  { %v212_v34 = vpop.f32.mrf.mxu0 }
  0xec   :  { %v285_v9 = vmax.f32 %v211_v62, 0.0  ;;  %v373_v34 = vld [vmem:[%s1835_s3 + $0x1e8] sm:$0xff] }
  0xed   :  { %v1470_v35 = vpop.f32.mrf.mxu0 }
  0xef   :  { %v217_v36 = vpop.f32.mrf.mxu0 }
  0xf0   :  { %v357_v36 = vld [vmem:[%s1835_s3 + $0x168] sm:$0xff] }
  0xf1   :  { %v220_v37 = vpop.f32.mrf.mxu0 }
  0xf2   :  { %v221_v20 = vadd.f32 %v1479_v55, %v220_v37 }
  0xf3   :  { %v222_v38 = vpop.f32.mrf.mxu0 }
  0xf4   :  { %v287_v31 = vmax.f32 %v221_v20, 0.0  ;;  %v546_v20 = vld [vmem:[%s1837_s5 + $0x78] sm:$0xff] }
  0xf5   :  { %v225_v39 = vpop.f32.mrf.mxu0 }
  0xf6   :  { %v226_v59 = vadd.f32 %v1479_v55, %v225_v39  ;;  %v372_v39 = vld [vmem:[%s1835_s3 + $0x1e0] sm:$0xff] }
  0xf7   :  { %v227_v40 = vpop.f32.mrf.mxu0 }
  0xf8   :  { %v288_v6 = vmax.f32 %v226_v59, 0.0  ;;  %v356_v40 = vld [vmem:[%s1835_s3 + $0x160] sm:$0xff]  ;;  %v349_v59 = vld [vmem:[%s1835_s3 + $0x128] sm:$0xff] }
  0xf9   :  { %v230_v41 = vpop.f32.mrf.mxu0 }
  0xfa   :  { %v231_v57 = vadd.f32 %v1479_v55, %v230_v41  ;;  %v300_v18 = vmax.f32 %v284_v12, %v288_v6  ;;  %v371_v41 = vld [vmem:[%s1835_s3 + $0x1d8] sm:$0xff]  ;;  %v346_v6 = vld [vmem:[%s1835_s3 + $0x110] sm:$0xff] }
  0xfb   :  { %v232_v42 = vpop.f32.mrf.mxu0 }
  0xfc   :  { %v289_v4 = vmax.f32 %v231_v57, 0.0  ;;  %v365_v57 = vld [vmem:[%s1835_s3 + $0x1a8] sm:$0xff] }
  0xfd   :  { %v1472_v43 = vpop.f32.mrf.mxu0 }
  0xfe   :  { %v301_v16 = vmax.f32 %v285_v9, %v289_v4  ;;  %v360_v9 = vld [vmem:[%s1835_s3 + $0x180] sm:$0xff] }
  0xff   :  { %v237_v44 = vpop.f32.mrf.mxu0 }
 0x100   :  { %v355_v44 = vld [vmem:[%s1835_s3 + $0x158] sm:$0xff] }
 0x101   :  { %v240_v45 = vpop.f32.mrf.mxu0 }
 0x102   :  { %v241_v15 = vadd.f32 %v1479_v55, %v240_v45  ;;  %v370_v45 = vld [vmem:[%s1835_s3 + $0x1d0] sm:$0xff] }
 0x103   :  { %v242_v46 = vpop.f32.mrf.mxu0 }
 0x104   :  { %v291_v26 = vmax.f32 %v241_v15, 0.0  ;;  %v354_v46 = vld [vmem:[%s1835_s3 + $0x150] sm:$0xff]  ;;  %v588_v15 = vld [vmem:[%s1837_s5 + $0x1c8] sm:$0xff] }
 0x105   :  { %v245_v47 = vpop.f32.mrf.mxu0 }
 0x106   :  { %v246_v60 = vadd.f32 %v1479_v55, %v245_v47  ;;  %v303_v37 = vmax.f32 %v287_v31, %v291_v26  ;;  %v369_v47 = vld [vmem:[%s1835_s3 + $0x1c8] sm:$0xff] }
 0x107   :  { %v247_v48 = vpop.f32.mrf.mxu0  ;;  %v544_v26 = vld [vmem:[%s1837_s5 + $0x68] sm:$0xff] }
 0x108   :  { %v292_v7 = vmax.f32 %v246_v60, 0.0  ;;  %v353_v48 = vld [vmem:[%s1835_s3 + $0x148] sm:$0xff]  ;;  %v364_v60 = vld [vmem:[%s1835_s3 + $0x1a0] sm:$0xff] }
 0x109   :  { %v250_v49 = vpop.f32.mrf.mxu0  ;;  %v584_v31 = vld [vmem:[%s1837_s5 + $0x1a8] sm:$0xff] }
 0x10a   :  { %v251_v63 = vadd.f32 %v1479_v55, %v250_v49  ;;  %v368_v49 = vld [vmem:[%s1835_s3 + $0x1c0] sm:$0xff] }
 0x10b   :  { %v252_v50 = vpop.f32.mrf.mxu0 }
 0x10c   :  { %v293_v10 = vmax.f32 %v251_v63, 0.0  ;;  %v352_v50 = vld [vmem:[%s1835_s3 + $0x140] sm:$0xff] }
 0x10d   :  { %v1474_v51 = vpop.f32.mrf.mxu0  ;;  %v348_v63 = vld [vmem:[%s1835_s3 + $0x120] sm:$0xff] }
 0x10e   :  { %v256_v62 = vadd.f32 %v1479_v55, %v1474_v51  ;;  %v362_v51 = vld [vmem:[%s1835_s3 + $0x190] sm:$0xff] }
 0x10f   :  { %v257_v52 = vpop.f32.mrf.mxu0 }
 0x110   :  { %v367_v52 = vld [vmem:[%s1835_s3 + $0x1b8] sm:$0xff] }
 0x111   :  { %v260_v53 = vpop.f32.mrf.mxu0 }
 0x112   :  { %v261_v21 = vadd.f32 %v1479_v55, %v260_v53  ;;  %v351_v53 = vld [vmem:[%s1835_s3 + $0x138] sm:$0xff] }
 0x113   :  { %v262_v54 = vpop.f32.mrf.mxu0 }
 0x114   :  { %v295_v32 = vmax.f32 %v261_v21, 0.0  ;;  %v366_v54 = vld [vmem:[%s1835_s3 + $0x1b0] sm:$0xff]  ;;  %v586_v21 = vld [vmem:[%s1837_s5 + $0x1b8] sm:$0xff] }
 0x115   :  { %v265_v56 = vpop.f32.mrf.mxu0 }
 0x116   :  { %v266_v58 = vadd.f32 %v1479_v55, %v265_v56  ;;  %v350_v56 = vld [vmem:[%s1835_s3 + $0x130] sm:$0xff] }
 0x117   :  { %v267_v61 = vpop.f32.mrf.mxu0 }
 0x118   :  { %v296_v2 = vmax.f32 %v266_v58, 0.0  ;;  %v236_v61 = vadd.f32 %v1479_v55, %v1472_v43  ;;  %v347_v43 = vld [vmem:[%s1835_s3 + $0x118] sm:$0xff] }
 0x119   :  { %v270_v3 = vpop.f32.mrf.mxu0 }
 0x11a   :  { %v271_v5 = vadd.f32 %v1479_v55, %v270_v3  ;;  %v304_v13 = vmax.f32 %v292_v7, %v296_v2  ;;  %v216_v2 = vadd.f32 %v1479_v55, %v1470_v35  ;;  %v290_v4 = vmax.f32 %v236_v61, 0.0  ;;  %v361_v35 = vld [vmem:[%s1835_s3 + $0x188] sm:$0xff]  ;;  %v565_v61 = vld [vmem:[%s1837_s5 + $0x110] sm:$0xff] }
 0x11b   :  { %v272_v8 = vpop.f32.mrf.mxu0 }
 0x11c   :  { %v297_v11 = vmax.f32 %v271_v5, 0.0  ;;  %v308_v24 = vmax.f32 %v300_v18, %v304_v13  ;;  %v294_v5 = vmax.f32 %v256_v62, 0.0  ;;  %v345_v8 = vld [vmem:[%s1835_s3 + $0x108] sm:$0xff]  ;;  %v589_v13 = vld [vmem:[%s1837_s5 + $0x1d0] sm:$0xff]  ;;  %v571_v18 = vld [vmem:[%s1837_s5 + $0x140] sm:$0xff] }
 0x11d   :  { %v275_v14 = vpop.f32.mrf.mxu0  ;;  %998 = vmatprep.subr.mxu0 %v589_v13  ;;  %v533_v62 = vld [vmem:[%s1837_s5 + $0x10] sm:$0xff] }
 0x11e   :  { %v305_v17 = vmax.f32 %v293_v10, %v297_v11  ;;  %v276_v58 = vadd.f32 %v1479_v55, %v275_v14  ;;  %v344_v11 = vld [vmem:[%s1835_s3 + $0x100] sm:$0xff]  ;;  %v573_v14 = vld [vmem:[%s1837_s5 + $0x150] sm:$0xff] }
 0x11f   :  { %v277_v19 = vpop.f32.mrf.mxu0  ;;  %999 = vmatpush3.msra.mxu0 %v573_v14 }
 0x120   :  { %v309_v22 = vmax.f32 %v301_v16, %v305_v17  ;;  %v298_v3 = vmax.f32 %v276_v58, 0.0  ;;  %v572_v16 = vld [vmem:[%s1837_s5 + $0x148] sm:$0xff]  ;;  %v587_v17 = vld [vmem:[%s1837_s5 + $0x1c0] sm:$0xff]  ;;  %1000 = vmatprep.subr.mxu0 %v588_v15  ;;  %v562_v19 = vld [vmem:[%s1837_s5 + $0xf8] sm:$0xff] }
 0x121   :  { %v280_v23 = vpop.f32.mrf.mxu0  ;;  %1001 = vmatpush3.msra.mxu0 %v572_v16  ;;  %v550_v58 = vld [vmem:[%s1837_s5 + $0x98] sm:$0xff] }
 0x122   :  { %v281_v27 = vadd.f32 %v1479_v55, %v280_v23  ;;  %447 = vmatprep.mubr.f32.mxu1 %v309_v22  ;;  %v286_v55 = vmax.f32 %v216_v2, 0.0  ;;  %v306_v7 = vmax.f32 %v294_v5, %v298_v3  ;;  %v561_v22 = vld [vmem:[%s1837_s5 + $0xf0] sm:$0xff]  ;;  %1002 = vmatprep.subr.mxu0 %v587_v17  ;;  %v570_v23 = vld [vmem:[%s1837_s5 + $0x138] sm:$0xff]  ;;  %v564_v2 = vld [vmem:[%s1837_s5 + $0x108] sm:$0xff] }
 0x123   :  { %448 = vmatmul.mubr.f32.vlgmr.msra.gmra.mxu1 %v308_v24  ;;  %v282_v30 = vpop.f32.mrf.mxu0  ;;  %v545_v24 = vld [vmem:[%s1837_s5 + $0x70] sm:$0xff]  ;;  %1003 = vmatpush3.msra.mxu0 %v571_v18  ;;  %v532_v3 = vld [vmem:[%s1837_s5 + $0x8] sm:$0xff]  ;;  %v531_v5 = vld [vmem:[%s1837_s5] sm:$0xff] }
 0x124   :  { %v299_v33 = vmax.f32 %v281_v27, 0.0  ;;  %919 = vmatpush3.msra.mxu1 %v359_v25  ;;  %v302_v10 = vmax.f32 %v286_v55, %v290_v4  ;;  %v560_v25 = vld [vmem:[%s1837_s5 + $0xe8] sm:$0xff]  ;;  %v585_v27 = vld [vmem:[%s1837_s5 + $0x1b0] sm:$0xff]  ;;  %1004 = vmatprep.subr.mxu0 %v586_v21  ;;  %v543_v30 = vld [vmem:[%s1837_s5 + $0x60] sm:$0xff] }
 0x125   :  { %920 = vmatprep.subr.mxu1 %v374_v28  ;;  %v559_v28 = vld [vmem:[%s1837_s5 + $0xe0] sm:$0xff]  ;;  %1005 = vmatpush3.msra.mxu0 %v570_v23  ;;  %v758_v17 = vld [vmem:[%s1839_s7 + $0x78] sm:$0xff]  ;;  %v757_v18 = vld [vmem:[%s1839_s7 + $0x70] sm:$0xff] }
 0x126   :  { %v307_v38 = vmax.f32 %v295_v32, %v299_v33  ;;  %921 = vmatpush3.msra.mxu1 %v358_v29  ;;  %v310_v12 = vmax.f32 %v302_v10, %v306_v7  ;;  %v569_v29 = vld [vmem:[%s1837_s5 + $0x130] sm:$0xff]  ;;  %1006 = vmatprep.subr.mxu0 %v585_v27  ;;  %v558_v32 = vld [vmem:[%s1837_s5 + $0xd8] sm:$0xff]  ;;  %v568_v33 = vld [vmem:[%s1837_s5 + $0x128] sm:$0xff] }
 0x127   :  { %922 = vmatprep.subr.mxu1 %v373_v34  ;;  %1007 = vmatpush3.msra.mxu0 %v569_v29  ;;  %v542_v34 = vld [vmem:[%s1837_s5 + $0x58] sm:$0xff]  ;;  %v563_v4 = vld [vmem:[%s1837_s5 + $0x100] sm:$0xff]  ;;  %v752_v23 = vld [vmem:[%s1839_s7 + $0x48] sm:$0xff] }
 0x128   :  { %923 = vmatpush3.msra.mxu1 %v357_v36  ;;  %v311_v42 = vmax.f32 %v303_v37, %v307_v38  ;;  %v583_v36 = vld [vmem:[%s1837_s5 + $0x1a0] sm:$0xff]  ;;  %1008 = vmatprep.subr.mxu0 %v584_v31  ;;  %v557_v37 = vld [vmem:[%s1837_s5 + $0xd0] sm:$0xff]  ;;  %v754_v21 = vld [vmem:[%s1839_s7 + $0x58] sm:$0xff] }
 0x129   :  { %924 = vmatprep.subr.mxu1 %v372_v39  ;;  %v567_v38 = vld [vmem:[%s1837_s5 + $0x120] sm:$0xff]  ;;  %1009 = vmatpush3.msra.mxu0 %v568_v33  ;;  %v541_v39 = vld [vmem:[%s1837_s5 + $0x50] sm:$0xff]  ;;  %v748_v27 = vld [vmem:[%s1839_s7 + $0x28] sm:$0xff] }
 0x12a   :  { %925 = vmatpush3.msra.mxu1 %v356_v40  ;;  %517 = vmatprep.mubr.f32.mxu1 %v311_v42  ;;  %v582_v40 = vld [vmem:[%s1837_s5 + $0x198] sm:$0xff]  ;;  %v880_v7 = vld [vmem:[%s1836_s4] ss:$0 sm:$0xff]  ;;  %v744_v31 = vld [vmem:[%s1839_s7 + $0x8] sm:$0xff] }
 0x12b   :  { %926 = vmatprep.subr.mxu1 %v371_v41  ;;  %v556_v41 = vld [vmem:[%s1837_s5 + $0xc8] sm:$0xff]  ;;  %1010 = vmatprep.subr.mxu0 %v583_v36  ;;  %v566_v42 = vld [vmem:[%s1837_s5 + $0x118] sm:$0xff]  ;;  %v881_v36 = vld [vmem:[%s1838_s6] ss:$0 sm:$0xff]  ;;  %s1106_s6 = smov [#allocation2]  }
 0x12c   :  { %927 = vmatpush3.msra.mxu1 %v355_v44  ;;  %v540_v44 = vld [vmem:[%s1837_s5 + $0x48] sm:$0xff]  ;;  %1011 = vmatpush3.msra.mxu0 %v567_v38  ;;  %v746_v29 = vld [vmem:[%s1839_s7 + $0x18] sm:$0xff]  ;;  %s855_s22 = sshll.u32 %s1106_s6, 4  ;;  %s856_s22 = int_to_ptr.vmem [resolvable:$true] %s855_s22 }
 0x12d   :  { %928 = vmatprep.subr.mxu1 %v370_v45  ;;  %v555_v45 = vld [vmem:[%s1837_s5 + $0xc0] sm:$0xff]  ;;  %1012 = vmatprep.subr.mxu0 %v582_v40  ;;  %p1087_p1 = scmp.lt.s32.totalorder %s856_s22, %s856_s22 }
 0x12e   :  { %929 = vmatpush3.msra.mxu1 %v354_v46  ;;  %v539_v46 = vld [vmem:[%s1837_s5 + $0x40] sm:$0xff]  ;;  %1013 = vmatpush3.msra.mxu0 %v566_v42 }
 0x12f   :  { %930 = vmatprep.subr.mxu1 %v369_v47  ;;  %v554_v47 = vld [vmem:[%s1837_s5 + $0xb8] sm:$0xff] }
 0x130   :  { %931 = vmatpush3.msra.mxu1 %v353_v48  ;;  %v538_v48 = vld [vmem:[%s1837_s5 + $0x38] sm:$0xff] }
 0x131   :  { %932 = vmatprep.subr.mxu1 %v368_v49  ;;  %v553_v49 = vld [vmem:[%s1837_s5 + $0xb0] sm:$0xff] }
 0x132   :  { %933 = vmatpush3.msra.mxu1 %v352_v50  ;;  %v537_v50 = vld [vmem:[%s1837_s5 + $0x30] sm:$0xff] }
 0x133   :  { %934 = vmatprep.subr.mxu1 %v367_v52  ;;  %v552_v52 = vld [vmem:[%s1837_s5 + $0xa8] sm:$0xff] }
 0x134   :  { %935 = vmatpush3.msra.mxu1 %v351_v53  ;;  %v536_v53 = vld [vmem:[%s1837_s5 + $0x28] sm:$0xff] }
 0x135   :  { %936 = vmatprep.subr.mxu1 %v366_v54  ;;  %v581_v54 = vld [vmem:[%s1837_s5 + $0x190] sm:$0xff] }
 0x136   :  { %937 = vmatpush3.msra.mxu1 %v350_v56  ;;  %1014 = vmatprep.subr.mxu0 %v581_v54  ;;  %v551_v56 = vld [vmem:[%s1837_s5 + $0xa0] sm:$0xff] }
 0x137   :  { %938 = vmatprep.subr.mxu1 %v365_v57  ;;  %v535_v57 = vld [vmem:[%s1837_s5 + $0x20] sm:$0xff]  ;;  %1015 = vmatpush3.msra.mxu0 %v565_v61 }
 0x138   :  { %939 = vmatpush3.msra.mxu1 %v349_v59  ;;  %v534_v59 = vld [vmem:[%s1837_s5 + $0x18] sm:$0xff] }
 0x139   :  { %940 = vmatprep.subr.mxu1 %v364_v60  ;;  %v549_v60 = vld [vmem:[%s1837_s5 + $0x90] sm:$0xff] }
 0x13a   :  { %941 = vmatpush3.msra.mxu1 %v348_v63  ;;  %v580_v63 = vld [vmem:[%s1837_s5 + $0x188] sm:$0xff] }
 0x13b   :  { %942 = vmatprep.subr.mxu1 %v363_v0  ;;  %v548_v0 = vld [vmem:[%s1837_s5 + $0x88] sm:$0xff]  ;;  %1016 = vmatprep.subr.mxu0 %v580_v63 }
 0x13c   :  { %943 = vmatpush3.msra.mxu1 %v347_v43  ;;  %1017 = vmatpush3.msra.mxu0 %v564_v2  ;;  %v579_v43 = vld [vmem:[%s1837_s5 + $0x180] sm:$0xff] }
 0x13d   :  { %944 = vmatprep.subr.mxu1 %v362_v51  ;;  %v547_v51 = vld [vmem:[%s1837_s5 + $0x80] sm:$0xff]  ;;  %1018 = vmatprep.subr.mxu0 %v579_v43 }
 0x13e   :  { %945 = vmatpush3.msra.mxu1 %v346_v6  ;;  %1019 = vmatpush3.msra.mxu0 %v563_v4 }
 0x13f   :  { %946 = vmatprep.subr.mxu1 %v361_v35 }
 0x140   :  { %947 = vmatpush3.msra.mxu1 %v345_v8 }
 0x141   :  { %948 = vmatprep.subr.mxu1 %v360_v9 }
 0x142   :  { %949 = vmatpush3.msra.mxu1 %v344_v11 }
 0x143   :  { %518 = vmatmul.mubr.f32.vlgmr.msra.gmra.mxu1 %v310_v12  ;;  %953 = vmatprep.subr.mxu1 %v562_v19  ;;  %v756_v19 = vld [vmem:[%s1839_s7 + $0x68] sm:$0xff] }
 0x144   :  { %954 = vmatpush3.msra.mxu1 %v546_v20  ;;  %v755_v20 = vld [vmem:[%s1839_s7 + $0x60] sm:$0xff] }
 0x145   :  { %955 = vmatprep.subr.mxu1 %v561_v22  ;;  %v753_v22 = vld [vmem:[%s1839_s7 + $0x50] sm:$0xff] }
 0x146   :  { %956 = vmatpush3.msra.mxu1 %v545_v24  ;;  %v751_v24 = vld [vmem:[%s1839_s7 + $0x40] sm:$0xff] }
 0x147   :  { %957 = vmatprep.subr.mxu1 %v560_v25  ;;  %v750_v25 = vld [vmem:[%s1839_s7 + $0x38] sm:$0xff] }
 0x148   :  { %958 = vmatpush3.msra.mxu1 %v544_v26  ;;  %v749_v26 = vld [vmem:[%s1839_s7 + $0x30] sm:$0xff] }
 0x149   :  { %959 = vmatprep.subr.mxu1 %v559_v28  ;;  %v747_v28 = vld [vmem:[%s1839_s7 + $0x20] sm:$0xff] }
 0x14a   :  { %960 = vmatpush3.msra.mxu1 %v543_v30  ;;  %v745_v30 = vld [vmem:[%s1839_s7 + $0x10] sm:$0xff] }
 0x14b   :  { %961 = vmatprep.subr.mxu1 %v558_v32  ;;  %v743_v32 = vld [vmem:[%s1839_s7] sm:$0xff] }
 0x14c   :  { %962 = vmatpush3.msra.mxu1 %v542_v34 }
 0x14d   :  { %963 = vmatprep.subr.mxu1 %v557_v37 }
 0x14e   :  { %964 = vmatpush3.msra.mxu1 %v541_v39 }
 0x14f   :  { %965 = vmatprep.subr.mxu1 %v556_v41 }
 0x150   :  { %966 = vmatpush3.msra.mxu1 %v540_v44 }
 0x151   :  { %967 = vmatprep.subr.mxu1 %v555_v45  ;;  %v882_v45 = vld [vmem:[%s1840_s8] ss:$0 sm:$0xff]  ;;  %s1082_s8 = scalar_lea.vmem %s856_s22, 32 }
 0x152   :  { %968 = vmatpush3.msra.mxu1 %v539_v46  ;;  %p1083_p0 = scmp.ne.s32.totalorder %s856_s22, %s1082_s8  ;;  %p1088_p2 = scmp.lt.s32.totalorder %s1082_s8, %s1082_s8 }
 0x153   :  { %969 = vmatprep.subr.mxu1 %v554_v47 }
 0x154   :  { %970 = vmatpush3.msra.mxu1 %v538_v48  ;;  %p1089_p3 = por %p1088_p2, %p1087_p1 }
 0x155   :  { %971 = vmatprep.subr.mxu1 %v553_v49 }
 0x156   :  { %972 = vmatpush3.msra.mxu1 %v537_v50  ;;  %p1090_p4 = pnand %p1089_p3, %p1083_p0 }
 0x157   :  { %973 = vmatprep.subr.mxu1 %v552_v52 }
 0x158   :  { %974 = vmatpush3.msra.mxu1 %v536_v53 }
 0x159   :  { %975 = vmatprep.subr.mxu1 %v551_v56 }
 0x15a   :  { %976 = vmatpush3.msra.mxu1 %v535_v57 }
 0x15b   :  { %977 = vmatprep.subr.mxu1 %v550_v58 }
 0x15c   :  { %978 = vmatpush3.msra.mxu1 %v534_v59 }
 0x15d   :  { %979 = vmatprep.subr.mxu1 %v549_v60 }
 0x15e   :  { %980 = vmatpush3.msra.mxu1 %v533_v62 }
 0x15f   :  { %981 = vmatprep.subr.mxu1 %v548_v0 }
 0x160   :  { %982 = vmatpush3.msra.mxu1 %v532_v3 }
 0x161   :  { %983 = vmatprep.subr.mxu1 %v547_v51 }
 0x162   :  { %984 = vmatpush3.msra.mxu1 %v531_v5 }
 0x163   :  { %1040 = vmatprep.subr.mxu1 %v1104_v1 }
 0x1e3   :  { %v915_v6 = vpop.f32.mrf.mxu1 }
 0x1e5   :  { %v916_v35 = vpop.f32.mrf.mxu1 }
 0x1e6   :  { %v917_v55 = vadd.f32 %v916_v35, %v915_v6 }
 0x1e8   :  { %v450_v10 = vadd.f32 %v917_v55, %v880_v7 }
 0x203   :  { %v950_v8 = vpop.f32.mrf.mxu1 }
 0x205   :  { %v951_v9 = vpop.f32.mrf.mxu1 }
 0x206   :  { %v952_v11 = vadd.f32 %v951_v9, %v950_v8 }
 0x208   :  { %v520_v12 = vadd.f32 %v952_v11, %v450_v10 }
 0x20a   :  { %v523_v13 = vmax.f32 %v520_v12, 0.0 }
 0x20c   :  { %v527_v14 = vrot.slane %v523_v13, 4  ;;  %v525_v15 = vrot.slane %v523_v13, 2  ;;  %v529_v16 = vrot.slane %v523_v13, 6 }
 0x20e   :  { %666 = vmatprep.mubr.f32.mxu1 %v525_v15  ;;  %736 = vmatprep.mubr.f32.mxu0 %v529_v16 }
 0x20f   :  { %667 = vmatmul.mubr.f32.vlgmr.msra.gmra.mxu1 %v523_v13  ;;  %737 = vmatmul.mubr.f32.vlgmr.msra.gmra.mxu0 %v527_v14 }
 0x210   :  { %1041 = vmatpush3.msra.mxu1 %v758_v17  ;;  %1072 = vmatprep.mubr.msk.f32.mxu1 %vm1105_vm1, %v1104_v1 }
 0x211   :  { %1042 = vmatprep.subr.mxu1 %v1104_v1 }
 0x212   :  { %1043 = vmatpush3.msra.mxu1 %v757_v18 }
 0x213   :  { %1044 = vmatprep.subr.mxu1 %v1104_v1 }
 0x214   :  { %1045 = vmatpush3.msra.mxu1 %v756_v19 }
 0x215   :  { %1046 = vmatprep.subr.mxu1 %v1104_v1 }
 0x216   :  { %1047 = vmatpush3.msra.mxu1 %v755_v20 }
 0x217   :  { %1048 = vmatprep.subr.mxu1 %v1104_v1 }
 0x218   :  { %1049 = vmatpush3.msra.mxu1 %v754_v21 }
 0x219   :  { %1050 = vmatprep.subr.mxu1 %v1104_v1 }
 0x21a   :  { %1051 = vmatpush3.msra.mxu1 %v753_v22 }
 0x21b   :  { %1052 = vmatprep.subr.mxu1 %v1104_v1 }
 0x21c   :  { %1053 = vmatpush3.msra.mxu1 %v752_v23 }
 0x21d   :  { %1054 = vmatprep.subr.mxu1 %v1104_v1 }
 0x21e   :  { %1055 = vmatpush3.msra.mxu1 %v751_v24 }
 0x21f   :  { %1056 = vmatprep.subr.mxu1 %v1104_v1 }
 0x220   :  { %1057 = vmatpush3.msra.mxu1 %v750_v25 }
 0x221   :  { %1058 = vmatprep.subr.mxu1 %v1104_v1 }
 0x222   :  { %1059 = vmatpush3.msra.mxu1 %v749_v26 }
 0x223   :  { %1060 = vmatprep.subr.mxu1 %v1104_v1 }
 0x224   :  { %1061 = vmatpush3.msra.mxu1 %v748_v27 }
 0x225   :  { %1062 = vmatprep.subr.mxu1 %v1104_v1 }
 0x226   :  { %1063 = vmatpush3.msra.mxu1 %v747_v28 }
 0x227   :  { %1064 = vmatprep.subr.mxu1 %v1104_v1 }
 0x228   :  { %1065 = vmatpush3.msra.mxu1 %v746_v29 }
 0x229   :  { %1066 = vmatprep.subr.mxu1 %v1104_v1 }
 0x22a   :  { %1067 = vmatpush3.msra.mxu1 %v745_v30 }
 0x22b   :  { %1068 = vmatprep.subr.mxu1 %v1104_v1 }
 0x22c   :  { %1069 = vmatpush3.msra.mxu1 %v744_v31 }
 0x22d   :  { %1070 = vmatprep.subr.mxu1 %v1104_v1 }
 0x22e   :  { %1071 = vmatpush3.msra.mxu1 %v743_v32 }
 0x2cf   :  { %v985_v33 = vpop.f32.mrf.mxu1  ;;  %v1020_v34 = vpop.f32.mrf.mxu0 }
 0x2d1   :  { %v986_v37 = vpop.f32.mrf.mxu1  ;;  %v1021_v38 = vpop.f32.mrf.mxu0 }
 0x2d2   :  { %v987_v39 = vadd.f32 %v986_v37, %v985_v33  ;;  %v1022_v41 = vadd.f32 %v1021_v38, %v1020_v34 }
 0x2d4   :  { %v669_v40 = vadd.f32 %v987_v39, %v881_v36 }
 0x2d6   :  { %v739_v42 = vadd.f32 %v1022_v41, %v669_v40 }
 0x2d8   :  { %v742_v44 = vmax.f32 %v739_v42, 0.0 }
 0x2da   :  { %1073 = vmatmul.mubr.f32.vlgmr.msra.gmra.mxu1 %v742_v44 }
 0x39a   :  { %v832_v46 = vpop.f32.mrf.mxu1 }
 0x39b   :  { %v833_v1 = vadd.f32 %v882_v45, %v832_v46 }
 0x39c   :  { %v1074_v47 = vpop.f32.mrf.mxu1 }
 0x39d   :  { %v837_v48 = vsel %vm836_vm2, %v833_v1, -inf }
 0x39e   :  { %838 = vmax.xlane.f32.xlu0 %v837_v48 }
 0x427   :  { %v839_v49 = vpop.xlane.xlu0 %838 }
 0x428   :  { %v840_v50 = vsub.f32 %v833_v1, %v839_v49 }
 0x42a   :  { %v841_v52 = vmul.f32 1.442695, %v840_v50 }
 0x42c   :  { %1078 = vpow2.f32 %v841_v52 }
 0x439   :  { %v1079_v53 = vpop.eup %1078 }
 0x43a   :  { %v843_v54 = vsel %vm836_vm2, %v1079_v53, 0.0 }
 0x43b   :  { %844 = vadd.xlane.f32.xlu0 %v843_v54 }
 0x4c4   :  { %v845_v56 = vpop.xlane.xlu0 %844 }
 0x4c5   :  { %1080 = vrcp.f32 %v845_v56 }
 0x4d2   :  { %v1081_v57 = vpop.eup %1080 }
 0x4d3   :  { %v847_v58 = vmul.f32 %v1081_v57, %v1079_v53 }
 0x4d5   :  { %848 = vst [vmem:[#allocation2] sm:$0x3] %v847_v58 }
 0x4d6   :  { %1093 = shalt.err (!%p1090_p4)
}
 0x4d7   :  { %858 = dma.vmem_to_hbm [thread:$0]  %s856_s22, 32, %s1841_s9, [#allocation3]  }
 0x4d8   :  { %1102 = dma.done.wait [#allocation3], 32  }
 0x4d9   :  { %1103 = vsyncadd [#allocation3], 4294967264 }
 0x4da   :  { %862 = vsyncpa [#allocation3], 1 }

</bundles_post_ra>
